<compile_context>
chip_gen: v5e
topology: v5e:2x2
jax: 0.10.0
libtpu: 0.0.40
codegen_flags: <defaults>
</compile_context>

<pallas_src>
import jax
import jax.numpy as jnp
from jax.experimental import pallas as pl
from jax.experimental.pallas import tpu as pltpu

MAX_LENGTH = 64
PADW = 128        # lane width for logits / attn / hidden output rows
ENC_PAD = 128     # encoder rows padded to full MXU contraction width
NEG = -1e30       # finite "-inf" padding for softmax / log-softmax lanes


def attn_decoder_seq_kernel(ids_ref,        # [T] int32 (SMEM, scalar prefetch)
                            emb_ref,        # [1, 1, E] f32  (row ids[t] of embedding)
                            h0_ref,         # [1, H] f32     (initial hidden)
                            enc_ref,        # [ENC_PAD, H] bf16 (zero rows >= L)
                            w_front_ref,    # [E+H, 256] bf16 (attn | w_hh | comb-emb)
                            w_comb_ref,     # [H, E] bf16     (comb attn_applied part)
                            w_gru_ref,      # [E, 3H] bf16    (w_ih.T, gate order r|z|n)
                            w_out_ref,      # [H, PADW] bf16  (cols >= O are zero)
                            bias_ref,       # [8, 256] f32    (front | b_ih | out)
                            out_ref,        # [1, 8, PADW]    (logp | attn | hidden | 0)
                            h_scratch):     # VMEM [1, H] f32 (carried hidden state)
    f32 = jnp.float32
    bf16 = jnp.bfloat16
    H = h0_ref.shape[1]
    E = emb_ref.shape[2]
    OUTW = w_out_ref.shape[1]

    # hidden-state accumulator: initialize once at t == 0
    @pl.when(pl.program_id(0) == 0)
    def _():
        h_scratch[...] = h0_ref[...]

    emb = emb_ref[0]                      # [1, E]  (dropout == identity in eval mode)
    h = h_scratch[...]                    # [1, H]  f32 recurrent state

    # ---- fused front matmul: [emb|h] @ W_front -> attn logits, gh, comb-emb ----
    xh = jnp.concatenate([emb, h], axis=-1).astype(bf16)               # [1, E+H]
    front = (jnp.dot(xh, w_front_ref[...], preferred_element_type=f32)
             + bias_ref[0:1, :])                                       # [1, 256]
    attn_logits = front[:, :PADW]                                      # pads carry NEG
    gh = front[:, PADW:PADW + 3 * H]                                   # h @ w_hh.T + b_hh
    comb_emb = front[:, PADW + 3 * H:PADW + 3 * H + E]                 # emb part of combine

    # ---- attention softmax (exact division; pad lanes -> exp == 0) ----
    m = jnp.max(attn_logits, axis=-1, keepdims=True)
    ex = jnp.exp(attn_logits - m)
    attn_w = ex / jnp.sum(ex, axis=-1, keepdims=True)                  # [1, 128]

    # attn_applied = attn_weights @ encoder_outputs  (K = 128, zero-padded rows)
    attn_applied = jnp.dot(attn_w.astype(bf16), enc_ref[...],
                           preferred_element_type=f32)                 # [1, H]

    # x = relu(attn_combine(cat(embedded, attn_applied)))
    x = comb_emb + jnp.dot(attn_applied.astype(bf16), w_comb_ref[...],
                           preferred_element_type=f32)                 # [1, E]
    x = jnp.maximum(x, 0.0)

    # ---- single-step GRU (PyTorch gate order r, z, n) ----
    gi = (jnp.dot(x.astype(bf16), w_gru_ref[...], preferred_element_type=f32)
          + bias_ref[1:2, :3 * H])                                     # [1, 3H]
    g = gi + gh                                                        # full-width add
    rz = jax.nn.sigmoid(g[:, :2 * H])                                  # one sigmoid push
    r = rz[:, :H]
    z = rz[:, H:2 * H]
    n = jnp.tanh(gi[:, 2 * H:] + r * gh[:, 2 * H:])
    h_new = (1.0 - z) * n + z * h
    h_scratch[...] = h_new                                             # carry to t+1

    # ---- output log-softmax at 128 lanes (pad lanes carry NEG bias) ----
    logits = (jnp.dot(h_new.astype(bf16), w_out_ref[...], preferred_element_type=f32)
              + bias_ref[2:3, :OUTW])                                  # [1, 128]
    m2 = jnp.max(logits, axis=-1, keepdims=True)
    lse = m2 + jnp.log(jnp.sum(jnp.exp(logits - m2), axis=-1, keepdims=True))
    logp = logits - lse

    # one fully-written lane-dense [8,128] tile: logp | attn | hidden | zeros
    h_row = jnp.concatenate([h_new, jnp.zeros((1, PADW - H), f32)], axis=-1)
    slab = jnp.concatenate([logp, attn_w, h_row, jnp.zeros((5, PADW), f32)], axis=0)
    out_ref[...] = slab[None]


def init_params(key, hidden_size, embedding_size, output_size, max_length):
    ks = jax.random.split(key, 11)
    s = 0.1
    nrm = lambda k, shape: jax.random.normal(k, shape, jnp.float32) * s
    return {
        "embedding": nrm(ks[0], (output_size, embedding_size)),
        # PyTorch Linear weights stored [out_features, in_features]
        "attn_w": nrm(ks[1], (max_length, hidden_size + embedding_size)),
        "attn_b": nrm(ks[2], (max_length,)),
        "comb_w": nrm(ks[3], (embedding_size, hidden_size + embedding_size)),
        "comb_b": nrm(ks[4], (embedding_size,)),
        # GRU: [3H, E] / [3H, H], gate order (r, z, n)
        "w_ih": nrm(ks[5], (3 * hidden_size, embedding_size)),
        "w_hh": nrm(ks[6], (3 * hidden_size, hidden_size)),
        "b_ih": nrm(ks[7], (3 * hidden_size,)),
        "b_hh": nrm(ks[8], (3 * hidden_size,)),
        "out_w": nrm(ks[9], (output_size, hidden_size)),
        "out_b": nrm(ks[10], (output_size,)),
    }


def prepare_weights(params, hidden_size, embedding_size, max_length):
    """One-time repack of PyTorch-layout weights into kernel layout (not per step)."""
    H, E, L = hidden_size, embedding_size, max_length
    O = params["out_w"].shape[0]
    FRONT = 256
    assert L <= PADW and O <= PADW and 3 * H <= PADW
    assert PADW + 3 * H + E <= FRONT, "front fusion packing assumes 128+3H+E <= 256"
    f32, bf16 = jnp.float32, jnp.bfloat16

    # W_front columns: [attn(128) | gh = w_hh.T (3H, hidden rows only) | comb emb part (E)]
    w_front = jnp.zeros((E + H, FRONT), f32)
    w_front = w_front.at[:, :L].set(params["attn_w"].T)                       # cat(emb,h)
    w_front = w_front.at[E:, PADW:PADW + 3 * H].set(params["w_hh"].T)         # h rows only
    w_front = w_front.at[:E, PADW + 3 * H:PADW + 3 * H + E].set(
        params["comb_w"][:, :E].T)                                            # emb rows only

    w_comb_attn = params["comb_w"][:, E:].T                                   # [H, E]
    w_gru_ih = params["w_ih"].T                                               # [E, 3H]
    w_out = jnp.zeros((H, PADW), f32).at[:, :O].set(params["out_w"].T)

    bias = jnp.zeros((8, FRONT), f32)
    bias = bias.at[0, :PADW].set(NEG).at[0, :L].set(params["attn_b"])         # softmax pad
    bias = bias.at[0, PADW:PADW + 3 * H].set(params["b_hh"])
    bias = bias.at[0, PADW + 3 * H:PADW + 3 * H + E].set(params["comb_b"])
    bias = bias.at[1, :3 * H].set(params["b_ih"])
    bias = bias.at[2, :PADW].set(NEG).at[2, :O].set(params["out_b"])          # logsoftmax pad

    return {
        "embedding": params["embedding"].reshape(-1, 1, E).astype(f32),       # [V,1,E]
        "w_front": w_front.astype(bf16),
        "w_comb_attn": w_comb_attn.astype(bf16),
        "w_gru_ih": w_gru_ih.astype(bf16),
        "w_out": w_out.astype(bf16),
        "bias": bias,
        "dims": (H, E, L, O),
        "front": FRONT,
    }


def make_decoder(prepped, T):
    """Returns jitted (token_ids[T], hidden[1,1,H], enc[L,H]) -> (logp, h_final, attn, hiddens)."""
    H, E, L, O = prepped["dims"]
    FRONT = prepped["front"]
    emb_table = prepped["embedding"]
    weights = (prepped["w_front"], prepped["w_comb_attn"], prepped["w_gru_ih"],
               prepped["w_out"], prepped["bias"])

    grid_spec = pltpu.PrefetchScalarGridSpec(
        num_scalar_prefetch=1,                 # token ids -> SMEM, drive the emb index_map
        grid=(T,),
        in_specs=[
            # in-kernel embedding gather: one row per step, selected by prefetched ids
            pl.BlockSpec((1, 1, E), lambda t, ids: (ids[t], 0, 0)),
            # everything below: constant index_map -> DMA'd once, VMEM-resident
            pl.BlockSpec((1, H), lambda t, ids: (0, 0)),
            pl.BlockSpec((ENC_PAD, H), lambda t, ids: (0, 0)),
            pl.BlockSpec((E + H, FRONT), lambda t, ids: (0, 0)),
            pl.BlockSpec((H, E), lambda t, ids: (0, 0)),
            pl.BlockSpec((E, 3 * H), lambda t, ids: (0, 0)),
            pl.BlockSpec((H, PADW), lambda t, ids: (0, 0)),
            pl.BlockSpec((8, FRONT), lambda t, ids: (0, 0)),
        ],
        out_specs=pl.BlockSpec((1, 8, PADW), lambda t, ids: (t, 0, 0)),
        scratch_shapes=[pltpu.VMEM((1, H), jnp.float32)],   # recurrent hidden (f32)
    )

    flops_per_step = 2 * ((E + H) * FRONT + ENC_PAD * H + H * E + E * 3 * H + H * PADW)
    call = pl.pallas_call(
        attn_decoder_seq_kernel,
        grid_spec=grid_spec,
        out_shape=jax.ShapeDtypeStruct((T, 8, PADW), jnp.float32),
        compiler_params=pltpu.CompilerParams(
            dimension_semantics=("arbitrary",)),             # sequential recurrence
        cost_estimate=pl.CostEstimate(flops=T * flops_per_step,
                                      transcendentals=T * 360,
                                      bytes_accessed=70_000 + T * 4_500),
    )

    @jax.jit
    def decode(token_ids, hidden, encoder_outputs):
        h0 = hidden.reshape(1, H).astype(jnp.float32)
        enc_pad = jnp.zeros((ENC_PAD, H), jnp.bfloat16).at[:L, :].set(
            encoder_outputs.astype(jnp.bfloat16))
        slab = call(token_ids.astype(jnp.int32), emb_table, h0, enc_pad, *weights)
        logp = slab[:, 0, :O]            # [T, O]  per-step log-probs
        attn_w = slab[:, 1, :L]          # [T, L]  per-step attention weights
        hiddens = slab[:, 2, :H]         # [T, H]  per-step hidden states
        return logp, hiddens[-1].reshape(1, 1, H), attn_w, hiddens

    return decode


def reference_decode(tokens, hidden, encoder_outputs, params, H, E):
    """Pure f32 step-by-step reference matching the PyTorch module semantics."""
    hp = lambda a, b: jnp.dot(a, b, precision="highest")
    h = hidden.reshape(1, H)
    logps, attns, hs = [], [], []
    for tok in tokens:
        emb = params["embedding"][tok].reshape(1, E)
        cat1 = jnp.concatenate([emb, h], axis=1)
        attn_w = jax.nn.softmax(hp(cat1, params["attn_w"].T) + params["attn_b"], axis=1)
        attn_applied = hp(attn_w, encoder_outputs)
        cat2 = jnp.concatenate([emb, attn_applied], axis=1)
        x = jnp.maximum(hp(cat2, params["comb_w"].T) + params["comb_b"], 0.0)
        gi = hp(x, params["w_ih"].T) + params["b_ih"]
        gh = hp(h, params["w_hh"].T) + params["b_hh"]
        r = jax.nn.sigmoid(gi[:, :H] + gh[:, :H])
        z = jax.nn.sigmoid(gi[:, H:2 * H] + gh[:, H:2 * H])
        n = jnp.tanh(gi[:, 2 * H:] + r * gh[:, 2 * H:])
        h = (1.0 - z) * n + z * h
        logp = jax.nn.log_softmax(hp(h, params["out_w"].T) + params["out_b"], axis=1)
        logps.append(logp), attns.append(attn_w), hs.append(h)
    return (jnp.concatenate(logps, 0), jnp.concatenate(attns, 0),
            jnp.concatenate(hs, 0))


if __name__ == "__main__":
    hidden_size = 32
    embedding_size = 32
    output_size = 40
    max_length = MAX_LENGTH
    T = 8

    key = jax.random.PRNGKey(0)
    kp, kh, ke = jax.random.split(key, 3)
    params = init_params(kp, hidden_size, embedding_size, output_size, max_length)

    prepped = prepare_weights(params, hidden_size, embedding_size, max_length)
    decode = make_decoder(prepped, T)

    tokens = [5, 1, 7, 3, 0, 12, 33, 9]                       # deterministic token stream
    token_ids = jnp.array(tokens, dtype=jnp.int32)
    hidden = jax.random.normal(kh, (1, 1, hidden_size), jnp.float32)
    encoder_outputs = jax.random.normal(ke, (max_length, hidden_size), jnp.float32)

    logp, h_final, attn_w, hiddens = decode(token_ids, hidden, encoder_outputs)
    jax.block_until_ready((logp, h_final, attn_w, hiddens))

    ref_logp, ref_attn, ref_hs = reference_decode(
        tokens, hidden, encoder_outputs, params, hidden_size, embedding_size)

    assert logp.shape == (T, output_size)
    assert attn_w.shape == (T, max_length)
    assert hiddens.shape == (T, hidden_size)
    assert h_final.shape == (1, 1, hidden_size)
    # tolerance reflects bf16 MXU operand rounding propagated through an
    # 8-step GRU recurrence, compared against a full-f32 ("highest") reference
    tol = dict(atol=3e-2, rtol=3e-2)
    assert jnp.allclose(attn_w, ref_attn, **tol)
    assert jnp.allclose(hiddens, ref_hs, **tol)
    assert jnp.allclose(h_final.reshape(1, hidden_size), ref_hs[-1:], **tol)
    assert jnp.allclose(logp, ref_logp, **tol)

    print("KERNEL_OK")
</pallas_src>

<mosaic_0001>
module attributes {stable_mosaic.version = 11 : i64} {
  func.func @attn_decoder_seq_kernel(%arg0: i32, %arg1: memref<8xi32, #tpu.memory_space<smem>>, %arg2: memref<1x1x32xf32, #tpu.memory_space<vmem>>, %arg3: memref<1x32xf32, #tpu.memory_space<vmem>>, %arg4: memref<128x32xbf16, #tpu.memory_space<vmem>>, %arg5: memref<64x256xbf16, #tpu.memory_space<vmem>>, %arg6: memref<32x32xbf16, #tpu.memory_space<vmem>>, %arg7: memref<32x96xbf16, #tpu.memory_space<vmem>>, %arg8: memref<32x128xbf16, #tpu.memory_space<vmem>>, %arg9: memref<8x256xf32, #tpu.memory_space<vmem>>, %arg10: memref<1x8x128xf32, #tpu.memory_space<vmem>>, %arg11: memref<1x32xf32, #tpu.memory_space<vmem>>) attributes {dimension_semantics = [#tpu.dimension_semantics<arbitrary>], iteration_bounds = array<i64: 8>, scalar_prefetch = 1 : i64, scratch_operands = 1 : i64, tpu.core_type = #tpu.core_type<tc>, window_params = [{transform_indices = @transform_0, window_bounds = array<i64: 1, 1, 32>}, {pipeline_mode = #tpu.pipeline_mode<synchronous>, transform_indices = @transform_1, window_bounds = array<i64: 1, 32>}, {pipeline_mode = #tpu.pipeline_mode<synchronous>, transform_indices = @transform_2, window_bounds = array<i64: 128, 32>}, {pipeline_mode = #tpu.pipeline_mode<synchronous>, transform_indices = @transform_3, window_bounds = array<i64: 64, 256>}, {pipeline_mode = #tpu.pipeline_mode<synchronous>, transform_indices = @transform_4, window_bounds = array<i64: 32, 32>}, {pipeline_mode = #tpu.pipeline_mode<synchronous>, transform_indices = @transform_5, window_bounds = array<i64: 32, 96>}, {pipeline_mode = #tpu.pipeline_mode<synchronous>, transform_indices = @transform_6, window_bounds = array<i64: 32, 128>}, {pipeline_mode = #tpu.pipeline_mode<synchronous>, transform_indices = @transform_7, window_bounds = array<i64: 8, 256>}, {transform_indices = @transform_8, window_bounds = array<i64: 1, 8, 128>}]} {
    %c0_i32 = arith.constant 0 : i32
    %0 = arith.cmpi eq, %arg0, %c0_i32 : i32
    %1 = arith.extui %0 : i1 to i32
    %c0_i32_0 = arith.constant 0 : i32
    %2 = arith.cmpi ne, %1, %c0_i32_0 : i32
    scf.if %2 {
      %c0_37 = arith.constant 0 : index
      %c0_38 = arith.constant 0 : index
      %80 = vector.load %arg3[%c0_37, %c0_38] : memref<1x32xf32, #tpu.memory_space<vmem>>, vector<1x32xf32>
      %c0_39 = arith.constant 0 : index
      %c0_40 = arith.constant 0 : index
      %81 = vector.load %arg11[%c0_39, %c0_40] : memref<1x32xf32, #tpu.memory_space<vmem>>, vector<1x32xf32>
      tpu.vector_store %arg11[%c0_39, %c0_40], %80 {strides = array<i32>} : memref<1x32xf32, #tpu.memory_space<vmem>>, vector<1x32xf32>,
    } else {
    }
    %c0 = arith.constant 0 : index
    %c0_1 = arith.constant 0 : index
    %c0_2 = arith.constant 0 : index
    %3 = vector.load %arg2[%c0, %c0_1, %c0_2] : memref<1x1x32xf32, #tpu.memory_space<vmem>>, vector<1x1x32xf32>
    %4 = vector.shape_cast %3 : vector<1x1x32xf32> to vector<1x32xf32>
    %c0_3 = arith.constant 0 : index
    %c0_4 = arith.constant 0 : index
    %5 = vector.load %arg11[%c0_3, %c0_4] : memref<1x32xf32, #tpu.memory_space<vmem>>, vector<1x32xf32>
    %6 = tpu.concatenate %4, %5 in 1 : vector<1x32xf32>, vector<1x32xf32> -> vector<1x64xf32>
    %7 = arith.truncf %6 : vector<1x64xf32> to vector<1x64xbf16>
    %c0_5 = arith.constant 0 : index
    %c0_6 = arith.constant 0 : index
    %8 = vector.load %arg5[%c0_5, %c0_6] : memref<64x256xbf16, #tpu.memory_space<vmem>>, vector<64x256xbf16>
    %cst = arith.constant dense<0.000000e+00> : vector<1x256xf32>
    %9 = tpu.matmul %7, %8, %cst {dimension_numbers = #tpu.dot_dimension_numbers<[1], [0], [0], [1], [0, 0, 1, 1], [], []>} : vector<1x64xbf16>, vector<64x256xbf16>, vector<1x256xf32> -> vector<1x256xf32>
    %c0_7 = arith.constant 0 : index
    %c0_8 = arith.constant 0 : index
    %10 = vector.load %arg9[%c0_7, %c0_8] : memref<8x256xf32, #tpu.memory_space<vmem>>, vector<1x256xf32>
    %11 = arith.addf %9, %10 : vector<1x256xf32>
    %12 = vector.extract_strided_slice %11 {offsets = [0, 0], sizes = [1, 128], strides = [1, 1]} : vector<1x256xf32> to vector<1x128xf32>
    %13 = vector.extract_strided_slice %11 {offsets = [0, 128], sizes = [1, 96], strides = [1, 1]} : vector<1x256xf32> to vector<1x96xf32>
    %14 = vector.extract_strided_slice %11 {offsets = [0, 224], sizes = [1, 32], strides = [1, 1]} : vector<1x256xf32> to vector<1x32xf32>
    %cst_9 = arith.constant dense<0xFF800000> : vector<1xf32>
    %15 = vector.multi_reduction <maximumf>, %12, %cst_9 [1] : vector<1x128xf32> to vector<1xf32>
    %16 = vector.shape_cast %15 : vector<1xf32> to vector<1x1xf32>
    %17 = vector.broadcast %16 : vector<1x1xf32> to vector<1x128xf32>
    %18 = arith.subf %12, %17 : vector<1x128xf32>
    %19 = math.exp %18 : vector<1x128xf32>
    %cst_10 = arith.constant dense<0.000000e+00> : vector<1xf32>
    %20 = vector.multi_reduction <add>, %19, %cst_10 [1] : vector<1x128xf32> to vector<1xf32>
    %21 = vector.shape_cast %20 : vector<1xf32> to vector<1x1xf32>
    %22 = vector.broadcast %21 : vector<1x1xf32> to vector<1x128xf32>
    %23 = arith.divf %19, %22 : vector<1x128xf32>
    %24 = arith.truncf %23 : vector<1x128xf32> to vector<1x128xbf16>
    %c0_11 = arith.constant 0 : index
    %c0_12 = arith.constant 0 : index
    %25 = vector.load %arg4[%c0_11, %c0_12] : memref<128x32xbf16, #tpu.memory_space<vmem>>, vector<128x32xbf16>
    %cst_13 = arith.constant dense<0.000000e+00> : vector<1x32xf32>
    %26 = tpu.matmul %24, %25, %cst_13 {dimension_numbers = #tpu.dot_dimension_numbers<[1], [0], [0], [1], [0, 0, 1, 1], [], []>} : vector<1x128xbf16>, vector<128x32xbf16>, vector<1x32xf32> -> vector<1x32xf32>
    %27 = arith.truncf %26 : vector<1x32xf32> to vector<1x32xbf16>
    %c0_14 = arith.constant 0 : index
    %c0_15 = arith.constant 0 : index
    %28 = vector.load %arg6[%c0_14, %c0_15] : memref<32x32xbf16, #tpu.memory_space<vmem>>, vector<32x32xbf16>
    %cst_16 = arith.constant dense<0.000000e+00> : vector<1x32xf32>
    %29 = tpu.matmul %27, %28, %cst_16 {dimension_numbers = #tpu.dot_dimension_numbers<[1], [0], [0], [1], [0, 0, 1, 1], [], []>} : vector<1x32xbf16>, vector<32x32xbf16>, vector<1x32xf32> -> vector<1x32xf32>
    %30 = arith.addf %14, %29 : vector<1x32xf32>
    %cst_17 = arith.constant 0.000000e+00 : f32
    %31 = vector.broadcast %cst_17 : f32 to vector<1x32xf32>
    %32 = arith.maximumf %30, %31 : vector<1x32xf32>
    %33 = arith.truncf %32 : vector<1x32xf32> to vector<1x32xbf16>
    %c0_18 = arith.constant 0 : index
    %c0_19 = arith.constant 0 : index
    %34 = vector.load %arg7[%c0_18, %c0_19] : memref<32x96xbf16, #tpu.memory_space<vmem>>, vector<32x96xbf16>
    %cst_20 = arith.constant dense<0.000000e+00> : vector<1x96xf32>
    %35 = tpu.matmul %33, %34, %cst_20 {dimension_numbers = #tpu.dot_dimension_numbers<[1], [0], [0], [1], [0, 0, 1, 1], [], []>} : vector<1x32xbf16>, vector<32x96xbf16>, vector<1x96xf32> -> vector<1x96xf32>
    %c1 = arith.constant 1 : index
    %c0_21 = arith.constant 0 : index
    %36 = vector.load %arg9[%c1, %c0_21] : memref<8x256xf32, #tpu.memory_space<vmem>>, vector<1x96xf32>
    %37 = arith.addf %35, %36 : vector<1x96xf32>
    %38 = arith.addf %37, %13 : vector<1x96xf32>
    %39 = vector.extract_strided_slice %38 {offsets = [0, 0], sizes = [1, 64], strides = [1, 1]} : vector<1x96xf32> to vector<1x64xf32>
    %40 = arith.negf %39 : vector<1x64xf32>
    %41 = math.exp %40 : vector<1x64xf32>
    %cst_22 = arith.constant 1.000000e+00 : f32
    %42 = vector.broadcast %cst_22 : f32 to vector<1x64xf32>
    %43 = arith.addf %42, %41 : vector<1x64xf32>
    %44 = arith.divf %42, %43 : vector<1x64xf32>
    %45 = vector.extract_strided_slice %44 {offsets = [0, 0], sizes = [1, 32], strides = [1, 1]} : vector<1x64xf32> to vector<1x32xf32>
    %46 = vector.extract_strided_slice %44 {offsets = [0, 32], sizes = [1, 32], strides = [1, 1]} : vector<1x64xf32> to vector<1x32xf32>
    %47 = vector.extract_strided_slice %37 {offsets = [0, 64], sizes = [1, 32], strides = [1, 1]} : vector<1x96xf32> to vector<1x32xf32>
    %48 = vector.extract_strided_slice %13 {offsets = [0, 64], sizes = [1, 32], strides = [1, 1]} : vector<1x96xf32> to vector<1x32xf32>
    %49 = arith.mulf %45, %48 : vector<1x32xf32>
    %50 = arith.addf %47, %49 : vector<1x32xf32>
    %51 = math.tanh %50 : vector<1x32xf32>
    %cst_23 = arith.constant 1.000000e+00 : f32
    %52 = vector.broadcast %cst_23 : f32 to vector<1x32xf32>
    %53 = arith.subf %52, %46 : vector<1x32xf32>
    %54 = arith.mulf %53, %51 : vector<1x32xf32>
    %55 = arith.mulf %46, %5 : vector<1x32xf32>
    %56 = arith.addf %54, %55 : vector<1x32xf32>
    %c0_24 = arith.constant 0 : index
    %c0_25 = arith.constant 0 : index
    %57 = vector.load %arg11[%c0_24, %c0_25] : memref<1x32xf32, #tpu.memory_space<vmem>>, vector<1x32xf32>
    tpu.vector_store %arg11[%c0_24, %c0_25], %56 {strides = array<i32>} : memref<1x32xf32, #tpu.memory_space<vmem>>, vector<1x32xf32>,
    %58 = arith.truncf %56 : vector<1x32xf32> to vector<1x32xbf16>
    %c0_26 = arith.constant 0 : index
    %c0_27 = arith.constant 0 : index
    %59 = vector.load %arg8[%c0_26, %c0_27] : memref<32x128xbf16, #tpu.memory_space<vmem>>, vector<32x128xbf16>
    %cst_28 = arith.constant dense<0.000000e+00> : vector<1x128xf32>
    %60 = tpu.matmul %58, %59, %cst_28 {dimension_numbers = #tpu.dot_dimension_numbers<[1], [0], [0], [1], [0, 0, 1, 1], [], []>} : vector<1x32xbf16>, vector<32x128xbf16>, vector<1x128xf32> -> vector<1x128xf32>
    %c2 = arith.constant 2 : index
    %c0_29 = arith.constant 0 : index
    %61 = vector.load %arg9[%c2, %c0_29] : memref<8x256xf32, #tpu.memory_space<vmem>>, vector<1x128xf32>
    %62 = arith.addf %60, %61 : vector<1x128xf32>
    %cst_30 = arith.constant dense<0xFF800000> : vector<1xf32>
    %63 = vector.multi_reduction <maximumf>, %62, %cst_30 [1] : vector<1x128xf32> to vector<1xf32>
    %64 = vector.shape_cast %63 : vector<1xf32> to vector<1x1xf32>
    %65 = vector.broadcast %64 : vector<1x1xf32> to vector<1x128xf32>
    %66 = arith.subf %62, %65 : vector<1x128xf32>
    %67 = math.exp %66 : vector<1x128xf32>
    %cst_31 = arith.constant dense<0.000000e+00> : vector<1xf32>
    %68 = vector.multi_reduction <add>, %67, %cst_31 [1] : vector<1x128xf32> to vector<1xf32>
    %69 = vector.shape_cast %68 : vector<1xf32> to vector<1x1xf32>
    %70 = math.log %69 : vector<1x1xf32>
    %71 = arith.addf %64, %70 : vector<1x1xf32>
    %72 = vector.broadcast %71 : vector<1x1xf32> to vector<1x128xf32>
    %73 = arith.subf %62, %72 : vector<1x128xf32>
    %cst_32 = arith.constant 0.000000e+00 : f32
    %74 = vector.broadcast %cst_32 : f32 to vector<1x96xf32>
    %75 = tpu.concatenate %56, %74 in 1 : vector<1x32xf32>, vector<1x96xf32> -> vector<1x128xf32>
    %cst_33 = arith.constant 0.000000e+00 : f32
    %76 = vector.broadcast %cst_33 : f32 to vector<5x128xf32>
    %77 = tpu.concatenate %73, %23, %75, %76 in 0 : vector<1x128xf32>, vector<1x128xf32>, vector<1x128xf32>, vector<5x128xf32> -> vector<8x128xf32>
    %78 = vector.shape_cast %77 : vector<8x128xf32> to vector<1x8x128xf32>
    %c0_34 = arith.constant 0 : index
    %c0_35 = arith.constant 0 : index
    %c0_36 = arith.constant 0 : index
    %79 = vector.load %arg10[%c0_34, %c0_35, %c0_36] : memref<1x8x128xf32, #tpu.memory_space<vmem>>, vector<1x8x128xf32>
    tpu.vector_store %arg10[%c0_34, %c0_35, %c0_36], %78 {strides = array<i32>} : memref<1x8x128xf32, #tpu.memory_space<vmem>>, vector<1x8x128xf32>,
    return
  }
  func.func @transform_0(%arg0: i32, %arg1: memref<8xi32, #tpu.memory_space<smem>>) -> (i32, i32, i32) {
    %0 = arith.index_cast %arg0 : i32 to index
    %1 = memref.load %arg1[%0] : memref<8xi32, #tpu.memory_space<smem>>
    %c0_i32 = arith.constant 0 : i32
    %c0_i32_0 = arith.constant 0 : i32
    %c0_i32_1 = arith.constant 0 : i32
    return %1, %c0_i32, %c0_i32_0 : i32, i32, i32
  }
  func.func @transform_1(%arg0: i32, %arg1: memref<8xi32, #tpu.memory_space<smem>>) -> (i32, i32) {
    %c0_i32 = arith.constant 0 : i32
    %c0_i32_0 = arith.constant 0 : i32
    %c0_i32_1 = arith.constant 0 : i32
    return %c0_i32, %c0_i32_0 : i32, i32
  }
  func.func @transform_2(%arg0: i32, %arg1: memref<8xi32, #tpu.memory_space<smem>>) -> (i32, i32) {
    %c0_i32 = arith.constant 0 : i32
    %c0_i32_0 = arith.constant 0 : i32
    %c0_i32_1 = arith.constant 0 : i32
    return %c0_i32, %c0_i32_0 : i32, i32
  }
  func.func @transform_3(%arg0: i32, %arg1: memref<8xi32, #tpu.memory_space<smem>>) -> (i32, i32) {
    %c0_i32 = arith.constant 0 : i32
    %c0_i32_0 = arith.constant 0 : i32
    %c0_i32_1 = arith.constant 0 : i32
    return %c0_i32, %c0_i32_0 : i32, i32
  }
  func.func @transform_4(%arg0: i32, %arg1: memref<8xi32, #tpu.memory_space<smem>>) -> (i32, i32) {
    %c0_i32 = arith.constant 0 : i32
    %c0_i32_0 = arith.constant 0 : i32
    %c0_i32_1 = arith.constant 0 : i32
    return %c0_i32, %c0_i32_0 : i32, i32
  }
  func.func @transform_5(%arg0: i32, %arg1: memref<8xi32, #tpu.memory_space<smem>>) -> (i32, i32) {
    %c0_i32 = arith.constant 0 : i32
    %c0_i32_0 = arith.constant 0 : i32
    %c0_i32_1 = arith.constant 0 : i32
    return %c0_i32, %c0_i32_0 : i32, i32
  }
  func.func @transform_6(%arg0: i32, %arg1: memref<8xi32, #tpu.memory_space<smem>>) -> (i32, i32) {
    %c0_i32 = arith.constant 0 : i32
    %c0_i32_0 = arith.constant 0 : i32
    %c0_i32_1 = arith.constant 0 : i32
    return %c0_i32, %c0_i32_0 : i32, i32
  }
  func.func @transform_7(%arg0: i32, %arg1: memref<8xi32, #tpu.memory_space<smem>>) -> (i32, i32) {
    %c0_i32 = arith.constant 0 : i32
    %c0_i32_0 = arith.constant 0 : i32
    %c0_i32_1 = arith.constant 0 : i32
    return %c0_i32, %c0_i32_0 : i32, i32
  }
  func.func @transform_8(%arg0: i32, %arg1: memref<8xi32, #tpu.memory_space<smem>>) -> (i32, i32, i32) {
    %c0_i32 = arith.constant 0 : i32
    %c0_i32_0 = arith.constant 0 : i32
    %c0_i32_1 = arith.constant 0 : i32
    return %arg0, %c0_i32, %c0_i32_0 : i32, i32, i32
  }
}

</mosaic_0001>

<bundles_post_ra>
// kernel: decode.1
= control target key start
LH: loop header
LB: loop body
LE: loop exit
PB: predicated region body
PF: predicated region fallthrough
CT: control target
= control target key end

     0   :  { %s927_s12 = smov [#allocation4]   ;;  %s1146_s0 = inlined_call_operand.vmem [shape: s32[8], index: 0, kind: input, shape index: {}]   ;;  %s1147_s1 = inlined_call_operand.vmem [shape: f32[40,1,32], index: 1, kind: input, shape index: {}]   ;;  %s1148_s2 = inlined_call_operand.vmem [shape: f32[1,32], index: 2, kind: input, shape index: {}]   ;;  %s1149_s3 = inlined_call_operand.vmem [shape: bf16[128,32], index: 3, kind: input, shape index: {}]   ;;  %s1150_s4 = inlined_call_operand.vmem [shape: bf16[64,256], index: 4, kind: input, shape index: {}]   ;;  %s1151_s5 = inlined_call_operand.vmem [shape: bf16[32,32], index: 5, kind: input, shape index: {}]   ;;  %s1152_s6 = inlined_call_operand.vmem [shape: bf16[32,96], index: 6, kind: input, shape index: {}]   ;;  %s1153_s7 = inlined_call_operand.vmem [shape: bf16[32,128], index: 7, kind: input, shape index: {}]   ;;  %s1154_s8 = inlined_call_operand.vmem [shape: f32[8,256], index: 8, kind: input, shape index: {}]   ;;  %s1155_s9 = inlined_call_operand.vmem [shape: f32[8,8,128], index: 9, kind: output, shape index: {}]  }
   0x1   :  { %s15_s11 = sshll.u32 %s1146_s0, 4  ;;  %s16_s11 = int_to_ptr.vmem [resolvable:$true] %s15_s11 }
   0x2   :  { %18 = dma.vmem_to_smem %s16_s11, 16, %s927_s12, [#allocation3] }
   0x3   :  { %921 = dma.done.wait [#allocation3], 16 }
   0x4   :  { %922 = vsyncadd [#allocation3], 4294967280 }
   0x5   :  { %21 = sfence }
   0x6   :  { %s984_s13 = smov 0  }
   0x7 LB: > { %s753_s14 = sadd.s32 4294967295, %s925_s13   ;;  %p757_p0 = scmp.ge.s32.totalorder %s925_s13, 1  ;;  %s925_s13 = sphi %s984_s13, %s27_s13  }
   0x8   : > { %p273_p1 = scmp.lt.s32.totalorder %s925_s13, 9 }
   0xa   : > { %p274_p2 = pnand %p757_p0, %p273_p1 }
   0xb   : > { %s305_s0 = sld [smem:[#allocation4 + %s753_s14]] (!%p274_p2)  ;;  %p310_p3 = scmp.lt.s32.totalorder (!%p274_p2), %s753_s14, 7 }
   0xc   : > { %277 = sbr.rel (%p274_p2) target bundleno = 1866 (0x74a), region = 52  ;;  %p759_p5 = scmp.ne.s32.totalorder (!%p274_p2), %s753_s14, 0 }
  0x11   : > { %s311_s15 = scalar_select %p310_p3, %s753_s14, 7 }
  0x12   : > { %p306_p4 = scmp.lt.s32.totalorder %s305_s0, 39  ;;  %318 = sbr.rel (%p759_p5) target bundleno = 25 (0x19), region = 56 }
  0x13   : > { %s758_s16 = sshll.u32 %s311_s15, 3 }
  0x14   : > { %s995_s19 = scalar_lea.vmem %s1155_s9, %s758_s16  ;;  %s1157_s0 = smov (!%p306_p4, %s305_s0), 39 }
  0x15   : > { %s308_s22 = scalar_lea.vmem %s1147_s1, %s1157_s0 }
  0x17   : > { %v319_v0 = vld [vmem:[%s1148_s2] sm:$0x1]  ;;  %vm320_vm0 = vcmask 253952  }
  0x18   : > { %321 = vst.msk [vmem:[#allocation2] sm:$0x1] %vm320_vm0, %v319_v0 }
  0x19 PF: > { %v786_v2 = vld [vmem:[%s1150_s4 + $0x30] sm:$0xf]  ;;  %v863_v3 = vld [vmem:[%s1150_s4 + $0x34] sm:$0xf0]  ;;  %v862_v4 = vld [vmem:[%s1150_s4 + $0x34] sm:$0xf] }
  0x1a   : > { %s928_s10 = smov 32   ;;  %v787_v5 = vor.u32 %v863_v3, %v786_v2  ;;  %v788_v6 = vld [vmem:[%s1150_s4 + $0x38] sm:$0xf0]  ;;  %v778_v7 = vld [vmem:[%s1150_s4 + $0x20] sm:$0xf]  ;;  %vm329_vm1 = vcmask 261120  }
  0x1b   : > { %v861_v8 = vld [vmem:[%s1150_s4 + $0x24] sm:$0xf0]  ;;  %v791_v9 = vor.u32 %v862_v4, %v788_v6  ;;  %v860_v10 = vld [vmem:[%s1150_s4 + $0x24] sm:$0xf]  ;;  %v780_v11 = vld [vmem:[%s1150_s4 + $0x28] sm:$0xf0] }
  0x1c   : > { %394 = vmatpush.bf16.msra.mxu0 %v787_v5  ;;  %v779_v12 = vor.u32 %v861_v8, %v778_v7  ;;  %v783_v13 = vor.u32 %v860_v10, %v780_v11  ;;  %v770_v14 = vld [vmem:[%s1150_s4 + $0x10] sm:$0xf]  ;;  %v859_v15 = vld [vmem:[%s1150_s4 + $0x14] sm:$0xf0]  ;;  %v858_v16 = vld [vmem:[%s1150_s4 + $0x14] sm:$0xf] }
  0x1d   : > { %407 = vmatpush.bf16.msra.mxu1 %v791_v9  ;;  %v772_v17 = vld [vmem:[%s1150_s4 + $0x18] sm:$0xf0]  ;;  %v771_v18 = vor.u32 %v859_v15, %v770_v14  ;;  %v762_v20 = vld [vmem:[%s1150_s4] sm:$0xf]  ;;  %v857_v21 = vld [vmem:[%s1150_s4 + $0x4] sm:$0xf0] }
  0x1e   : > { %v775_v19 = vor.u32 %v858_v16, %v772_v17  ;;  %v856_v22 = vld [vmem:[%s1150_s4 + $0x4] sm:$0xf]  ;;  %v763_v23 = vor.u32 %v857_v21, %v762_v20  ;;  %v764_v24 = vld [vmem:[%s1150_s4 + $0x8] sm:$0xf0]  ;;  %v322_v26 = vld [vmem:[%s308_s22] sm:$0x1] }
  0x1f   : > { %v890_v1 = vld [vmem:[#allocation2] ss:$0 sm:$0xff]  ;;  %v767_v25 = vor.u32 %v856_v22, %v764_v24  ;;  %vm386_vm2 = vcmask 523264   ;;  %vm416_vm3 = vcmask 1040384   ;;  %v871_v38 = vld [vmem:[%s1149_s3 + $0x38] sm:$0xff]  ;;  %v870_v39 = vld [vmem:[%s1149_s3 + $0x30] sm:$0xff] }
  0x20   : > { %326 = vrot.lane.b32.xlu0 %v890_v1, %s928_s10  ;;  %395 = vmatpush.bf16.msra.mxu0 %v779_v12  ;;  %v1067_v30 = vld [vmem:[%s1154_s8] ss:$8 sm:$0x3]  ;;  %v867_v47 = vld [vmem:[%s1149_s3 + $0x18] sm:$0xff]  ;;  %v866_v48 = vld [vmem:[%s1149_s3 + $0x10] sm:$0xff]  ;;  %s929_s22 = smov 96  }
  0x21   : > { %408 = vmatpush.bf16.msra.mxu1 %v783_v13  ;;  %v382_v31 = vperm.slane %v1067_v30, 0  ;;  %506 = vmatpush.bf16.msra.mxu2 %v871_v38  ;;  %v869_v40 = vld [vmem:[%s1149_s3 + $0x28] sm:$0xff]  ;;  %v868_v46 = vld [vmem:[%s1149_s3 + $0x20] sm:$0xff]  ;;  %v383_v9 = vperm.slane %v1067_v30, 1  ;;  %s930_s11 = smov 64   ;;  %vm638_vm12 = vcmask 253952  }
  0x22   : > { %v865_v49 = vld [vmem:[%s1149_s3 + $0x8] sm:$0xff]  ;;  %v864_v50 = vld [vmem:[%s1149_s3] sm:$0xff]  ;;  %vm698_vm13 = vcmask 1041408   ;;  %vm700_vm14 = vcmask 1042432  }
  0x23   : > { %v873_v51 = vld [vmem:[%s1151_s5 + $0x8] sm:$0xff]  ;;  %v872_v1 = vld [vmem:[%s1151_s5] sm:$0xff] }
  0x24   : > { %396 = vmatpush.bf16.msra.mxu0 %v771_v18  ;;  %545 = vmatpush.bf16.msra.mxu3 %v873_v51  ;;  %v875_v7 = vld [vmem:[%s1152_s6 + $0x8] sm:$0xff]  ;;  %v874_v8 = vld [vmem:[%s1152_s6] sm:$0xff] }
  0x25   : > { %409 = vmatpush.bf16.msra.mxu1 %v775_v19  ;;  %507 = vmatpush.bf16.msra.mxu2 %v870_v39  ;;  %v563_v16 = vld [vmem:[%s1154_s8 + $0x1] ss:$0 sm:$0xff] }
  0x28   : > { %397 = vmatpush.bf16.msra.mxu0 %v763_v23  ;;  %546 = vmatpush.bf16.msra.mxu3 %v872_v1 }
  0x29   : > { %410 = vmatpush.bf16.msra.mxu1 %v767_v25  ;;  %508 = vmatpush.bf16.msra.mxu2 %v869_v40  ;;  %v877_v40 = vld [vmem:[%s1153_s7 + $0x8] sm:$0xff] }
  0x2c   : > { %588 = vmatpush.bf16.msrb.mxu3 %v875_v7  ;;  %670 = vmatpush.bf16.msrb.mxu0 %v877_v40 }
  0x2d   : > { %509 = vmatpush.bf16.msra.mxu2 %v868_v46 }
  0x30   : > { %589 = vmatpush.bf16.msrb.mxu3 %v874_v8 }
  0x31   : > { %510 = vmatpush.bf16.msra.mxu2 %v867_v47 }
  0x35   : > { %511 = vmatpush.bf16.msra.mxu2 %v866_v48 }
  0x39   : > { %512 = vmatpush.bf16.msra.mxu2 %v865_v49 }
  0x3d   : > { %513 = vmatpush.bf16.msra.mxu2 %v864_v50  ;;  %v645_v50 = vld [vmem:[%s1154_s8 + $0x2] ss:$0 sm:$0xff] }
  0x92   : > { %v1060_v27 = vpop.permute.xlu0 %326 }
  0x93   : > { %v330_v28 = vsel %vm329_vm1, %v322_v26, %v1060_v27 }
  0x94   : > { %v331_v29 = vpack.c.bf16 %v330_v28, %v330_v28 }
  0x96   : > { %792 = vmatmul.msk.bf16.vlgmr.msra.gmra.mxu0 %vm386_vm2, %v331_v29  ;;  %793 = vmatmul.msk.bf16.vlgmr.msra.gmra.mxu1 %vm386_vm2, %v331_v29 }
 0x113   : > { %v399_v32 = vpop.f32.mrf.mxu0  ;;  %v1070_v33 = vpop.f32.mrf.mxu1 }
 0x114   : > { %v400_v34 = vadd.f32 %v399_v32, %v382_v31  ;;  %v413_v10 = vadd.f32 %v1070_v33, %v383_v9 }
 0x116   : > { %v417_v35 = vsel %vm416_vm3, %v400_v34, -inf }
 0x117   : > { %418 = vmax.xlane.f32.xlu0 %v417_v35 }
 0x11b   : > { %v401_v36 = vpop.f32.mrf.mxu0  ;;  %v414_v37 = vpop.f32.mrf.mxu1 }
 0x18a   : > { %v419_v41 = vpop.xlane.xlu0 %418 }
 0x18b   : > { %v420_v42 = vsub.f32 %v400_v34, %v419_v41  ;;  %v876_v41 = vld [vmem:[%s1153_s7] sm:$0xff] }
 0x18c   : > { %671 = vmatpush.bf16.msrb.mxu0 %v876_v41 }
 0x18d   : > { %v421_v43 = vmul.f32 1.442695, %v420_v42 }
 0x18f   : > { %891 = vpow2.f32 %v421_v43 }
 0x195   : > { %v892_v44 = vpop.eup %891 }
 0x196   : > { %v423_v45 = vsel %vm416_vm3, %v892_v44, 0.0 }
 0x197   : > { %424 = vadd.xlane.f32.xlu1 %v423_v45 }
 0x20a   : > { %v425_v52 = vpop.xlane.xlu1 %424 }
 0x20b   : > { %893 = vrcp.f32 %v425_v52  ;;  %v437_v56 = vand.u32 2147483648, %v425_v52  ;;  %v435_v58 = vand.u32 2147483647, %v425_v52  ;;  %vm431_vm5 = vweird.f32 %v425_v52 }
 0x20d   : > { %v438_v60 = vor.u32 1.1754944e-38, %v437_v56  ;;  %vm436_vm7 = vcmp.eq.f32.partialorder %v435_v58, 8.507059e+37 }
 0x211   : > { %v894_v53 = vpop.eup %893 }
 0x212   : > { %v427_v54 = vmul.f32 %v894_v53, %v425_v52  ;;  %vm432_vm4 = vweird.f32 %v894_v53 }
 0x213   : > { %vm433_vm6 = vmor %vm431_vm5, %vm432_vm4 }
 0x214   : > { %v428_v55 = vsub.f32 1.0, %v427_v54 }
 0x216   : > { %v429_v57 = vmul.f32 %v894_v53, %v428_v55 }
 0x218   : > { %v430_v59 = vadd.f32 %v894_v53, %v429_v57 }
 0x21a   : > { %v434_v61 = vsel %vm433_vm6, %v894_v53, %v430_v59 }
 0x21b   : > { %v439_v62 = vsel %vm436_vm7, %v438_v60, %v434_v61 }
 0x21c   : > { %v1101_v63 = vmul.f32 %v892_v44, %v439_v62 }
 0x21e   : > { %v441_v0 = vpack.c.bf16 %v1101_v63, %v1101_v63  ;;  %v692_v1 = vrot.slane %v1101_v63, 7 }
 0x220   : > { %514 = vmatmul.bf16.vlgmr.msra.gmra.mxu2 %v441_v0 }
 0x2a3   : > { %v515_v2 = vpop.f32.mrf.mxu2 }
 0x2a4   : > { %v519_v3 = vpack.c.bf16 %v515_v2, %v515_v2 }
 0x2a6   : > { %834 = vmatmul.msk.bf16.vlgmr.msra.gmra.mxu3 %vm329_vm1, %v519_v3 }
 0x2ab   : > { %v517_v4 = vpop.f32.mrf.mxu2 }
 0x329   : > { %v548_v5 = vpop.f32.mrf.mxu3 }
 0x32a   : > { %553 = vrot.lane.b32.xlu1 %v548_v5, %s929_s22 }
 0x331   : > { %v550_v6 = vpop.f32.mrf.mxu3 }
 0x39c   : > { %v554_v11 = vpop.permute.xlu1 %553 }
 0x39d   : > { %v556_v12 = vadd.f32 %v554_v11, %v413_v10 }
 0x39f   : > { %v557_v13 = vmax.f32 %v556_v12, 0.0 }
 0x3a1   : > { %v558_v14 = vpack.c.bf16 %v557_v13, %v557_v13 }
 0x3a3   : > { %565 = vrot.lane.b32.xlu2 %v558_v14, %s928_s10 }
 0x3ab   : > { %616 = vrot.lane.b32.xlu2 %v413_v10, %s930_s11 }
 0x3fd   : > { %v566_v15 = vpop.permute.xlu2 %565 }
 0x3fe   : > { %843 = vmatmul.msk.bf16.vlgmr.msrb.gmra.mxu3 %vm329_vm1, %v566_v15 }
 0x405   : > { %v617_v34 = vpop.permute.xlu2 %616 }
 0x481   : > { %v591_v17 = vpop.f32.mrf.mxu3 }
 0x482   : > { %v592_v18 = vadd.f32 %v591_v17, %v563_v16 }
 0x484   : > { %v595_v19 = vadd.f32 %v592_v18, %v413_v10 }
 0x486   : > { %v844_v20 = vmul.f32 -1.442695, %v595_v19 }
 0x488   : > { %895 = vpow2.f32 %v844_v20 }
 0x489   : > { %v593_v21 = vpop.f32.mrf.mxu3 }
 0x48e   : > { %v896_v22 = vpop.eup %895 }
 0x48f   : > { %v599_v23 = vadd.f32 1.0, %v896_v22 }
 0x491   : > { %897 = vrcp.f32 %v599_v23  ;;  %v611_v28 = vand.u32 2147483648, %v599_v23  ;;  %v609_v30 = vand.u32 2147483647, %v599_v23  ;;  %vm605_vm9 = vweird.f32 %v599_v23 }
 0x493   : > { %v612_v32 = vor.u32 1.1754944e-38, %v611_v28  ;;  %vm610_vm11 = vcmp.eq.f32.partialorder %v609_v30, 8.507059e+37 }
 0x497   : > { %v898_v24 = vpop.eup %897 }
 0x498   : > { %v601_v25 = vmul.f32 %v898_v24, %v599_v23  ;;  %vm606_vm8 = vweird.f32 %v898_v24 }
 0x499   : > { %vm607_vm10 = vmor %vm605_vm9, %vm606_vm8 }
 0x49a   : > { %v602_v26 = vsub.f32 1.0, %v601_v25 }
 0x49c   : > { %v603_v29 = vmul.f32 %v898_v24, %v602_v26 }
 0x49e   : > { %v604_v31 = vadd.f32 %v898_v24, %v603_v29 }
 0x4a0   : > { %v608_v33 = vsel %vm607_vm10, %v898_v24, %v604_v31 }
 0x4a1   : > { %v613_v35 = vsel %vm610_vm11, %v612_v32, %v608_v33 }
 0x4a2   : > { %v619_v36 = vmul.f32 %v617_v34, %v613_v35  ;;  %v626_v42 = vsub.f32 1.0, %v613_v35  ;;  %v632_v44 = vmul.f32 %v613_v35, %v1060_v27 }
 0x4a4   : > { %621 = vrot.lane.b32.xlu2 %v619_v36, %s930_s11 }
 0x4fe   : > { %v622_v37 = vpop.permute.xlu2 %621 }
 0x4ff   : > { %v624_v38 = vadd.f32 %v622_v37, %v592_v18 }
 0x501   : > { %899 = vtanh.f32 %v624_v38 }
 0x507   : > { %v900_v39 = vpop.eup %899 }
 0x508   : > { %628 = vrot.lane.b32.xlu2 %v900_v39, %s929_s22 }
 0x562   : > { %v629_v43 = vpop.permute.xlu2 %628 }
 0x563   : > { %v631_v45 = vmul.f32 %v629_v43, %v626_v42 }
 0x565   : > { %v633_v46 = vadd.f32 %v632_v44, %v631_v45 }
 0x567   : > { %635 = vrot.lane.b32.xlu0 %v633_v46, %s929_s22  ;;  %v640_v47 = vpack.c.bf16 %v633_v46, %v633_v46 }
 0x569   : > { %647 = vrot.lane.b32.xlu2 %v640_v47, %s929_s22 }
 0x5c3   : > { %v648_v48 = vpop.permute.xlu2 %647 }
 0x5c4   : > { %853 = vmatmul.msk.bf16.vlgmr.msrb.gmra.mxu0 %vm329_vm1, %v648_v48 }
 0x5d9   : > { %v636_v49 = vpop.permute.xlu0 %635 }
 0x5da   : > { %639 = vst.msk [vmem:[#allocation2] sm:$0x1] %vm638_vm12, %v636_v49  ;;  %v690_v62 = vsel %vm329_vm1, %v636_v49, 0.0 }
 0x5db   : > { %v695_v3 = vrot.slane %v690_v62, 6 }
 0x641   : > { %v673_v51 = vpop.f32.mrf.mxu0 }
 0x642   : > { %v674_v52 = vadd.f32 %v673_v51, %v645_v50 }
 0x644   : > { %v677_v27 = vsel %vm416_vm3, %v674_v52, -inf }
 0x645   : > { %678 = vmax.xlane.f32.xlu1 %v677_v27 }
 0x649   : > { %v675_v53 = vpop.f32.mrf.mxu0 }
 0x6b8   : > { %v679_v54 = vpop.xlane.xlu1 %678 }
 0x6b9   : > { %v680_v55 = vsub.f32 %v674_v52, %v679_v54 }
 0x6bb   : > { %v681_v56 = vmul.f32 1.442695, %v680_v55 }
 0x6bd   : > { %901 = vpow2.f32 %v681_v56 }
 0x6c3   : > { %v902_v57 = vpop.eup %901 }
 0x6c4   : > { %v683_v58 = vsel %vm416_vm3, %v902_v57, 0.0 }
 0x6c5   : > { %684 = vadd.xlane.f32.xlu2 %v683_v58 }
 0x738   : > { %v685_v59 = vpop.xlane.xlu2 %684 }
 0x739   : > { %903 = vlog2.f32 %v685_v59 }
 0x73f   : > { %v904_v60 = vpop.eup %903 }
 0x740   : > { %v687_v61 = vmul.f32 0.6931472, %v904_v60 }
 0x742   : > { %v688_v0 = vadd.f32 %v687_v61, %v679_v54 }
 0x744   : > { %v689_v2 = vsub.f32 %v674_v52, %v688_v0 }
 0x746   : > { %v697_v4 = vsel %vm416_vm3, %v689_v2, %v692_v1 }
 0x747   : > { %v699_v5 = vsel %vm698_vm13, %v697_v4, %v695_v3 }
 0x748   : > { %v701_v6 = vsel %vm700_vm14, %v699_v5, 0.0 }
 0x749   : > { %702 = vst [vmem:[%s995_s19] sm:$0xff] %v701_v6 }
 0x74a PF: > { %s27_s13 = sadd.s32 1, %s925_s13  }
 0x74b   : > { %p24_p6 = scmp.ge.s32.totalorder %s27_s13, 10  }
 0x74d   :  { %26 = sbr.rel (!%p24_p6) target bundleno = 7 (0x7), region = 86 }

</bundles_post_ra>
